<compile_context>
chip_gen: v7x
topology: tpu7x:2x2x1
jax: 0.10.0
libtpu: 0.0.40
codegen_flags: <defaults>
</compile_context>

<pallas_src>
import functools
import math

import jax
import jax.numpy as jnp
from jax import lax
from jax.experimental import pallas as pl
from jax.experimental.pallas import tpu as pltpu


def _bce_dice_kernel(pred_ref, target_ref, dice_out_ref, bce_out_ref, *,
                     smooth, n_maps, m_tile, needs_mask):
    x = pred_ref[...].astype(jnp.float32)    # (m_tile, hw) logits
    t = target_ref[...].astype(jnp.float32)  # (m_tile, hw) targets

    # Shared transcendental: e = exp(-|x|) feeds both sigmoid and BCE (EUP).
    e = jnp.exp(-jnp.abs(x))                 # EUP exp
    one_plus_e = 1.0 + e
    r = 1.0 / one_plus_e                     # EUP reciprocal; = sigmoid(|x|)
    p = jnp.where(x >= 0.0, r, e * r)        # sigmoid(x), numerically stable (VPU)
    log_term = jnp.log(one_plus_e)           # EUP log; = log(1 + exp(-|x|))

    # --- BCE with logits (stable): max(x,0) - x*t + log(1 + exp(-|x|)) ---
    bce_elem = jnp.maximum(x, 0.0) - x * t + log_term
    bce_row = jnp.sum(bce_elem, axis=-1, keepdims=True)      # (m_tile, 1)

    # --- Dice on sigmoid(pred), one row per (n, c) map ---
    inter = jnp.sum(p * t, axis=-1, keepdims=True)           # (m_tile, 1)
    denom = jnp.sum(p + t, axis=-1, keepdims=True)           # single reduction
    dice_row = 1.0 - (2.0 * inter + smooth) / (denom + smooth)

    if needs_mask:
        # Zero out rows that are zero padding (only when n_maps % m_tile != 0).
        i = pl.program_id(0)
        row_ids = lax.broadcasted_iota(jnp.int32, (m_tile, 1), 0) + i * m_tile
        valid = row_ids < n_maps
        dice_row = jnp.where(valid, dice_row, 0.0)
        bce_row = jnp.where(valid, bce_row, 0.0)

    dice_part = jnp.sum(dice_row)                            # scalar per block
    bce_part = jnp.sum(bce_row)

    # One unmasked, lane-dense (8, 128) store per output per grid step.
    dice_out_ref[...] = jnp.broadcast_to(dice_part, dice_out_ref.shape)
    bce_out_ref[...] = jnp.broadcast_to(bce_part, bce_out_ref.shape)


def bce_dice_loss(pred, target, smooth=1.0):
    assert pred.shape == target.shape and pred.ndim == 4
    n, c, h, w = pred.shape
    n_maps = n * c
    hw = h * w

    pred_f = pred.reshape(n_maps, hw)
    target_f = target.reshape(n_maps, hw)

    itemsize = jnp.dtype(pred.dtype).itemsize
    # Rows per grid step: multiple of 8, largest tile such that
    # 2 inputs x 2 pipeline buffers stay within ~24 MiB of VMEM.
    budget = 24 * 1024 * 1024
    m_tile = budget // (4 * hw * itemsize)
    m_tile = max(8, min(1024, (m_tile // 8) * 8))
    m_tile = min(m_tile, 8 * math.ceil(n_maps / 8))
    # TODO(synk): add a spatial (H*W) grid axis for maps too large for an
    # (8, H*W) f32 block to fit in VMEM.

    num_blocks = math.ceil(n_maps / m_tile)
    padded_rows = num_blocks * m_tile
    if padded_rows != n_maps:
        pad = padded_rows - n_maps
        pred_f = jnp.pad(pred_f, ((0, pad), (0, 0)))
        target_f = jnp.pad(target_f, ((0, pad), (0, 0)))

    kernel = functools.partial(
        _bce_dice_kernel, smooth=float(smooth), n_maps=n_maps, m_tile=m_tile,
        needs_mask=(padded_rows != n_maps))

    block_bytes = 2 * 2 * m_tile * hw * itemsize    # 2 inputs x 2 buffers
    vmem_limit = int(min(56 << 20, max(32 << 20, block_bytes + (4 << 20))))

    dice_part, bce_part = pl.pallas_call(
        kernel,
        out_shape=(
            jax.ShapeDtypeStruct((num_blocks, 8, 128), jnp.float32),
            jax.ShapeDtypeStruct((num_blocks, 8, 128), jnp.float32),
        ),
        grid_spec=pltpu.PrefetchScalarGridSpec(
            num_scalar_prefetch=0,
            grid=(num_blocks,),
            in_specs=[
                pl.BlockSpec((m_tile, hw), lambda i: (i, 0)),
                pl.BlockSpec((m_tile, hw), lambda i: (i, 0)),
            ],
            out_specs=[
                pl.BlockSpec((1, 8, 128), lambda i: (i, 0, 0)),
                pl.BlockSpec((1, 8, 128), lambda i: (i, 0, 0)),
            ],
        ),
        compiler_params=pltpu.CompilerParams(
            dimension_semantics=("parallel",),      # independent per-block partials
            vmem_limit_bytes=vmem_limit,
        ),
    )(pred_f, target_f)

    dice = jnp.sum(dice_part[:, 0, 0]) / jnp.float32(n_maps)
    bce = jnp.sum(bce_part[:, 0, 0]) / jnp.float32(n_maps * hw)
    return bce, dice


if __name__ == "__main__":
    key = jax.random.PRNGKey(0)
    k1, k2 = jax.random.split(key)

    # Small NCHW shapes consistent with the module's forward (pred = logits).
    N, C, H, W = 2, 4, 16, 16
    logits = jax.random.normal(k1, (N, C, H, W), dtype=jnp.float32)
    target = (jax.random.uniform(k2, (N, C, H, W)) > 0.5).astype(jnp.float32)

    bce, dice = bce_dice_loss(logits, target, smooth=1.0)
    jax.block_until_ready((bce, dice))

    # Pure-JAX reference (same math as the PyTorch module).
    bce_ref = jnp.mean(
        jnp.maximum(logits, 0.0) - logits * target
        + jnp.log(1.0 + jnp.exp(-jnp.abs(logits))))
    p = jax.nn.sigmoid(logits)
    inter = jnp.sum(p * target, axis=(2, 3))
    dice_ref = jnp.mean(
        1.0 - (2.0 * inter + 1.0)
        / (jnp.sum(p, axis=(2, 3)) + jnp.sum(target, axis=(2, 3)) + 1.0))

    assert jnp.allclose(bce, bce_ref, atol=1e-6, rtol=1e-5), (bce, bce_ref)
    assert jnp.allclose(dice, dice_ref, atol=1e-6, rtol=1e-5), (dice, dice_ref)

    print("KERNEL_OK")
</pallas_src>

<mosaic_0001>
module attributes {stable_mosaic.version = 11 : i64} {
  func.func @_bce_dice_kernel(%arg0: i32, %arg1: memref<8x256xf32, #tpu.memory_space<vmem>>, %arg2: memref<8x256xf32, #tpu.memory_space<vmem>>, %arg3: memref<1x8x128xf32, #tpu.memory_space<vmem>>, %arg4: memref<1x8x128xf32, #tpu.memory_space<vmem>>) attributes {dimension_semantics = [#tpu.dimension_semantics<parallel>], iteration_bounds = array<i64: 1>, scalar_prefetch = 0 : i64, scratch_operands = 0 : i64, tpu.core_type = #tpu.core_type<tc>, window_params = [{transform_indices = @transform_0, window_bounds = array<i64: 8, 256>}, {transform_indices = @transform_1, window_bounds = array<i64: 8, 256>}, {transform_indices = @transform_2, window_bounds = array<i64: 1, 8, 128>}, {transform_indices = @transform_3, window_bounds = array<i64: 1, 8, 128>}]} {
    %c0 = arith.constant 0 : index
    %c0_0 = arith.constant 0 : index
    %0 = vector.load %arg1[%c0, %c0_0] : memref<8x256xf32, #tpu.memory_space<vmem>>, vector<8x256xf32>
    %c0_1 = arith.constant 0 : index
    %c0_2 = arith.constant 0 : index
    %1 = vector.load %arg2[%c0_1, %c0_2] : memref<8x256xf32, #tpu.memory_space<vmem>>, vector<8x256xf32>
    %2 = math.absf %0 : vector<8x256xf32>
    %cst = arith.constant 0.000000e+00 : f32
    %3 = vector.broadcast %cst : f32 to vector<8x256xf32>
    %4 = arith.subf %3, %2 : vector<8x256xf32>
    %5 = math.exp %4 : vector<8x256xf32>
    %cst_3 = arith.constant 1.000000e+00 : f32
    %6 = vector.broadcast %cst_3 : f32 to vector<8x256xf32>
    %7 = arith.addf %6, %5 : vector<8x256xf32>
    %cst_4 = arith.constant 1.000000e+00 : f32
    %8 = vector.broadcast %cst_4 : f32 to vector<8x256xf32>
    %9 = arith.divf %8, %7 : vector<8x256xf32>
    %cst_5 = arith.constant 0.000000e+00 : f32
    %10 = vector.broadcast %cst_5 : f32 to vector<8x256xf32>
    %11 = arith.cmpf oge, %0, %10 : vector<8x256xf32>
    %12 = arith.mulf %5, %9 : vector<8x256xf32>
    %13 = arith.select %11, %9, %12 : vector<8x256xi1>, vector<8x256xf32>
    %14 = math.log %7 : vector<8x256xf32>
    %cst_6 = arith.constant 0.000000e+00 : f32
    %15 = vector.broadcast %cst_6 : f32 to vector<8x256xf32>
    %16 = arith.maximumf %0, %15 : vector<8x256xf32>
    %17 = arith.mulf %0, %1 : vector<8x256xf32>
    %18 = arith.subf %16, %17 : vector<8x256xf32>
    %19 = arith.addf %18, %14 : vector<8x256xf32>
    %cst_7 = arith.constant dense<0.000000e+00> : vector<8xf32>
    %20 = vector.multi_reduction <add>, %19, %cst_7 [1] : vector<8x256xf32> to vector<8xf32>
    %21 = vector.shape_cast %20 : vector<8xf32> to vector<8x1xf32>
    %22 = arith.mulf %13, %1 : vector<8x256xf32>
    %cst_8 = arith.constant dense<0.000000e+00> : vector<8xf32>
    %23 = vector.multi_reduction <add>, %22, %cst_8 [1] : vector<8x256xf32> to vector<8xf32>
    %24 = vector.shape_cast %23 : vector<8xf32> to vector<8x1xf32>
    %25 = arith.addf %13, %1 : vector<8x256xf32>
    %cst_9 = arith.constant dense<0.000000e+00> : vector<8xf32>
    %26 = vector.multi_reduction <add>, %25, %cst_9 [1] : vector<8x256xf32> to vector<8xf32>
    %27 = vector.shape_cast %26 : vector<8xf32> to vector<8x1xf32>
    %cst_10 = arith.constant 2.000000e+00 : f32
    %28 = vector.broadcast %cst_10 : f32 to vector<8x1xf32>
    %29 = arith.mulf %28, %24 : vector<8x1xf32>
    %cst_11 = arith.constant 1.000000e+00 : f32
    %30 = vector.broadcast %cst_11 : f32 to vector<8x1xf32>
    %31 = arith.addf %29, %30 : vector<8x1xf32>
    %cst_12 = arith.constant 1.000000e+00 : f32
    %32 = vector.broadcast %cst_12 : f32 to vector<8x1xf32>
    %33 = arith.addf %27, %32 : vector<8x1xf32>
    %34 = arith.divf %31, %33 : vector<8x1xf32>
    %cst_13 = arith.constant 1.000000e+00 : f32
    %35 = vector.broadcast %cst_13 : f32 to vector<8x1xf32>
    %36 = arith.subf %35, %34 : vector<8x1xf32>
    %37 = vector.shape_cast %36 : vector<8x1xf32> to vector<1x8x1xf32>
    %cst_14 = arith.constant dense<0.000000e+00> : vector<1xf32>
    %38 = vector.multi_reduction <add>, %37, %cst_14 [1, 2] : vector<1x8x1xf32> to vector<1xf32>
    %39 = vector.shape_cast %38 : vector<1xf32> to vector<1x1x1xf32>
    %40 = vector.extract %39[0, 0, 0] : f32 from vector<1x1x1xf32>
    %41 = vector.shape_cast %21 : vector<8x1xf32> to vector<1x8x1xf32>
    %cst_15 = arith.constant dense<0.000000e+00> : vector<1xf32>
    %42 = vector.multi_reduction <add>, %41, %cst_15 [1, 2] : vector<1x8x1xf32> to vector<1xf32>
    %43 = vector.shape_cast %42 : vector<1xf32> to vector<1x1x1xf32>
    %44 = vector.extract %43[0, 0, 0] : f32 from vector<1x1x1xf32>
    %45 = vector.broadcast %40 : f32 to vector<1x8x128xf32>
    %c0_16 = arith.constant 0 : index
    %c0_17 = arith.constant 0 : index
    %c0_18 = arith.constant 0 : index
    %46 = vector.load %arg3[%c0_16, %c0_17, %c0_18] : memref<1x8x128xf32, #tpu.memory_space<vmem>>, vector<1x8x128xf32>
    tpu.vector_store %arg3[%c0_16, %c0_17, %c0_18], %45 {strides = array<i32>} : memref<1x8x128xf32, #tpu.memory_space<vmem>>, vector<1x8x128xf32>,
    %47 = vector.broadcast %44 : f32 to vector<1x8x128xf32>
    %c0_19 = arith.constant 0 : index
    %c0_20 = arith.constant 0 : index
    %c0_21 = arith.constant 0 : index
    %48 = vector.load %arg4[%c0_19, %c0_20, %c0_21] : memref<1x8x128xf32, #tpu.memory_space<vmem>>, vector<1x8x128xf32>
    tpu.vector_store %arg4[%c0_19, %c0_20, %c0_21], %47 {strides = array<i32>} : memref<1x8x128xf32, #tpu.memory_space<vmem>>, vector<1x8x128xf32>,
    return
  }
  func.func @transform_0(%arg0: i32) -> (i32, i32) {
    %c0_i32 = arith.constant 0 : i32
    %c0_i32_0 = arith.constant 0 : i32
    return %arg0, %c0_i32 : i32, i32
  }
  func.func @transform_1(%arg0: i32) -> (i32, i32) {
    %c0_i32 = arith.constant 0 : i32
    %c0_i32_0 = arith.constant 0 : i32
    return %arg0, %c0_i32 : i32, i32
  }
  func.func @transform_2(%arg0: i32) -> (i32, i32, i32) {
    %c0_i32 = arith.constant 0 : i32
    %c0_i32_0 = arith.constant 0 : i32
    %c0_i32_1 = arith.constant 0 : i32
    return %arg0, %c0_i32, %c0_i32_0 : i32, i32, i32
  }
  func.func @transform_3(%arg0: i32) -> (i32, i32, i32) {
    %c0_i32 = arith.constant 0 : i32
    %c0_i32_0 = arith.constant 0 : i32
    %c0_i32_1 = arith.constant 0 : i32
    return %arg0, %c0_i32, %c0_i32_0 : i32, i32, i32
  }
}

</mosaic_0001>

<bundles_post_ra>
// kernel: tpu_custom_call.1
= control target key start
LH: loop header
LB: loop body
LE: loop exit
PB: predicated region body
PF: predicated region fallthrough
CT: control target
= control target key end

     0   :  { %9 = vsyncpa [#allocation3], 0  ;;  %s346_s0 = inlined_call_operand.hbm [shape: f32[8,256], index: 0, kind: input, shape index: {}]   ;;  %s347_s1 = inlined_call_operand.hbm [shape: f32[8,256], index: 1, kind: input, shape index: {}]   ;;  %s348_s2 = inlined_call_operand.hbm [shape: f32[1,8,128], index: 2, kind: output, shape index: {0}]   ;;  %s349_s3 = inlined_call_operand.hbm [shape: f32[1,8,128], index: 3, kind: output, shape index: {1}]  }
   0x1   :  { %10 = vsyncpa [#allocation6], 0 }
   0x2   :  { %11 = vsyncpa [#allocation4], 0 }
   0x3   :  { %12 = vsyncpa [#allocation9], 0  ;;  %s267_s12 = smov [#allocation2]   ;;  %s268_s14 = smov [#allocation5]  }
   0x4   :  { %s19_s13 = sshll.u32 %s267_s12, 4  ;;  %s29_s15 = sshll.u32 %s268_s14, 4  ;;  %s20_s13 = int_to_ptr.vmem [resolvable:$true] %s19_s13  ;;  %s30_s15 = int_to_ptr.vmem [resolvable:$true] %s29_s15 }
   0x5   :  { %s171_s18 = scalar_lea.hbm %s346_s0, 256 }
   0x6   :  { %p172_p0 = scmp.ne.s32.totalorder %s346_s0, %s171_s18  ;;  %p175_p1 = scmp.lt.u32.totalorder %s171_s18, %s346_s0 }
   0x8   :  { %p177_p2 = pnand %p175_p1, %p172_p0 }
   0xa   :  { %180 = shalt.err (!%p177_p2)
}
   0xb   :  { %s181_s23 = scalar_lea.vmem %s20_s13, 256  ;;  %p186_p4 = scmp.lt.s32.totalorder %s20_s13, %s20_s13 }
   0xc   :  { %p182_p3 = scmp.ne.s32.totalorder %s20_s13, %s181_s23  ;;  %p187_p5 = scmp.lt.s32.totalorder %s181_s23, %s181_s23 }
   0xe   :  { %p188_p6 = por %p187_p5, %p186_p4 }
  0x10   :  { %p189_p7 = pnand %p188_p6, %p182_p3 }
  0x12   :  { %192 = shalt.err (!%p189_p7)
}
  0x13   :  { %22 = dma.hbm_to_vmem [thread:$0]  %s346_s0, 256, %s20_s13, [#allocation3]  }
  0x14   :  { %s193_s28 = scalar_lea.hbm %s347_s1, 256 }
  0x15   :  { %p194_p8 = scmp.ne.s32.totalorder %s347_s1, %s193_s28  ;;  %p197_p9 = scmp.lt.u32.totalorder %s193_s28, %s347_s1 }
  0x17   :  { %p199_p10 = pnand %p197_p9, %p194_p8 }
  0x19   :  { %202 = shalt.err (!%p199_p10)
}
  0x1a   :  { %s203_s6 = scalar_lea.vmem %s30_s15, 256  ;;  %p208_p12 = scmp.lt.s32.totalorder %s30_s15, %s30_s15 }
  0x1b   :  { %p204_p11 = scmp.ne.s32.totalorder %s30_s15, %s203_s6  ;;  %p209_p13 = scmp.lt.s32.totalorder %s203_s6, %s203_s6 }
  0x1d   :  { %p210_p0 = por %p209_p13, %p208_p12 }
  0x1f   :  { %p211_p1 = pnand %p210_p0, %p204_p11 }
  0x21   :  { %214 = shalt.err (!%p211_p1)
}
  0x22   :  { %32 = dma.hbm_to_vmem [thread:$0]  %s347_s1, 256, %s30_s15, [#allocation6]  }
  0x23   :  { %259 = dma.done.wait [#allocation3], 256  }
  0x24   :  { %260 = vsyncadd [#allocation3], 4294967040 }
  0x25   :  { %261 = dma.done.wait [#allocation6], 256  }
  0x26   :  { %262 = vsyncadd [#allocation6], 4294967040  ;;  %v39_v0 = vld [vmem:[#allocation2] sm:$0xff]  ;;  %v40_v1 = vld [vmem:[#allocation2 + $0x8] sm:$0xff]  ;;  %vm94_vm2 = vcmask 7168   ;;  %s269_s1 = smov [#allocation7]  }
  0x27   :  { %v43_v2 = vand.u32 2147483647, %v39_v0  ;;  %v44_v3 = vand.u32 2147483647, %v40_v1  ;;  %v41_v12 = vld [vmem:[#allocation5] sm:$0xff]  ;;  %v42_v13 = vld [vmem:[#allocation5 + $0x8] sm:$0xff] }
  0x28   :  { %v67_v14 = vmax.f32 %v39_v0, 0.0  ;;  %v69_v15 = vmul.f32 %v41_v12, %v39_v0  ;;  %v68_v16 = vmax.f32 %v40_v1, 0.0  ;;  %v70_v17 = vmul.f32 %v42_v13, %v40_v1  ;;  %s125_s8 = sshll.u32 %s269_s1, 4  ;;  %s270_s9 = smov [#allocation8]   ;;  %s126_s8 = int_to_ptr.vmem [resolvable:$true] %s125_s8 }
  0x29   :  { %v45_v4 = vsub.f32 0.0, %v43_v2  ;;  %v46_v5 = vsub.f32 0.0, %v44_v3  ;;  %vm57_vm0 = vcmp.ge.f32.partialorder %v39_v0, 0.0  ;;  %vm58_vm1 = vcmp.ge.f32.partialorder %v40_v1, 0.0  ;;  %s135_s10 = sshll.u32 %s270_s9, 4  ;;  %s215_s13 = scalar_lea.vmem %s126_s8, 128  ;;  %s315_s10 = int_to_ptr.vmem [resolvable:$true] %s135_s10 }
  0x2a   :  { %v71_v21 = vsub.f32 %v67_v14, %v69_v15  ;;  %v72_v24 = vsub.f32 %v68_v16, %v70_v17  ;;  %p216_p2 = scmp.ne.s32.totalorder %s126_s8, %s215_s13  ;;  %p220_p3 = scmp.lt.s32.totalorder %s126_s8, %s126_s8 }
  0x2b   :  { %v47_v6 = vmul.f32 1.442695, %v45_v4  ;;  %v49_v7 = vmul.f32 1.442695, %v46_v5  ;;  %p221_p4 = scmp.lt.s32.totalorder %s215_s13, %s215_s13 }
  0x2d   :  { %157 = vpow2.f32 %v47_v6  ;;  %p222_p5 = por %p221_p4, %p220_p3 }
  0x2e   :  { %159 = vpow2.f32 %v49_v7 }
  0x2f   :  { %p223_p6 = pnand %p222_p5, %p216_p2 }
  0x37   :  { %v158_v8 = vpop.eup %157 }
  0x38   :  { %v160_v9 = vpop.eup %159  ;;  %v51_v10 = vadd.f32 1.0, %v158_v8 }
  0x39   :  { %v52_v11 = vadd.f32 1.0, %v160_v9 }
  0x3a   :  { %161 = vrcp.f32 %v51_v10 }
  0x3b   :  { %163 = vrcp.f32 %v52_v11 }
  0x3c   :  { %165 = vlog2.f32 %v51_v10 }
  0x3d   :  { %167 = vlog2.f32 %v52_v11 }
  0x44   :  { %v162_v18 = vpop.eup %161 }
  0x45   :  { %v164_v19 = vpop.eup %163  ;;  %v59_v20 = vmul.f32 %v162_v18, %v158_v8 }
  0x46   :  { %v166_v22 = vpop.eup %165  ;;  %v60_v23 = vmul.f32 %v164_v19, %v160_v9 }
  0x47   :  { %v168_v25 = vpop.eup %167  ;;  %v61_v26 = vsel %vm57_vm0, %v162_v18, %v59_v20  ;;  %v64_v27 = vmul.f32 0.6931472, %v166_v22 }
  0x48   :  { %v62_v28 = vsel %vm58_vm1, %v164_v19, %v60_v23  ;;  %v83_v29 = vadd.f32 %v61_v26, %v41_v12  ;;  %v66_v30 = vmul.f32 0.6931472, %v168_v25  ;;  %v78_v32 = vmul.f32 %v61_v26, %v41_v12 }
  0x49   :  { %v84_v31 = vadd.f32 %v62_v28, %v42_v13  ;;  %v79_v33 = vmul.f32 %v62_v28, %v42_v13  ;;  %v73_v34 = vadd.f32 %v71_v21, %v64_v27 }
  0x4a   :  { %v74_v35 = vadd.f32 %v72_v24, %v66_v30 }
  0x4b   :  { %v85_v36 = vadd.f32 %v84_v31, %v83_v29  ;;  %v80_v38 = vadd.f32 %v79_v33, %v78_v32 }
  0x4c   :  { %v75_v37 = vadd.f32 %v74_v35, %v73_v34 }
  0x4d   :  { %86 = vadd.xlane.f32.xlu0 %v85_v36 }
  0x4e   :  { %76 = vadd.xlane.f32.xlu1 %v75_v37 }
  0x51   :  { %81 = vadd.xlane.f32.xlu0 %v80_v38 }
  0xda   :  { %v87_v39 = vpop.xlane.xlu0 %86 }
  0xdb   :  { %v90_v40 = vadd.f32 1.0, %v87_v39  ;;  %v77_v41 = vpop.xlane.xlu1 %76 }
  0xdc   :  { %v105_v42 = vsel %vm94_vm2, %v77_v41, 0.0 }
  0xdd   :  { %169 = vrcp.f32 %v90_v40  ;;  %106 = vadd.xlane.f32.xlu0 %v105_v42 }
  0xde   :  { %v82_v43 = vpop.xlane.xlu0 %81 }
  0xdf   :  { %v88_v44 = vmul.f32 2.0, %v82_v43 }
  0xe1   :  { %v89_v45 = vadd.f32 1.0, %v88_v44 }
  0xe7   :  { %v170_v46 = vpop.eup %169 }
  0xe8   :  { %v92_v47 = vmul.f32 %v170_v46, %v89_v45 }
  0xea   :  { %v93_v48 = vsub.f32 1.0, %v92_v47 }
  0xec   :  { %v95_v49 = vsel %vm94_vm2, %v93_v48, 0.0 }
  0xed   :  { %96 = vadd.xlane.f32.xlu1 %v95_v49 }
 0x16a   :  { %v107_v50 = vpop.xlane.xlu0 %106 }
 0x16b   :  { %v108_v51 = vrot.slane %v107_v50, 4 }
 0x16d   :  { %v109_v52 = vadd.f32 %v108_v51, %v107_v50 }
 0x16f   :  { %v110_v53 = vrot.slane %v109_v52, 2 }
 0x171   :  { %v111_v57 = vadd.f32 %v110_v53, %v109_v52 }
 0x173   :  { %v112_v60 = vrot.slane %v111_v57, 1 }
 0x175   :  { %v113_v63 = vadd.f32 %v112_v60, %v111_v57 }
 0x17a   :  { %v97_v54 = vpop.xlane.xlu1 %96 }
 0x17b   :  { %v98_v55 = vrot.slane %v97_v54, 4 }
 0x17d   :  { %v99_v56 = vadd.f32 %v98_v55, %v97_v54 }
 0x17f   :  { %v100_v58 = vrot.slane %v99_v56, 2 }
 0x181   :  { %v101_v59 = vadd.f32 %v100_v58, %v99_v56 }
 0x183   :  { %v102_v61 = vrot.slane %v101_v59, 1 }
 0x185   :  { %v103_v62 = vadd.f32 %v102_v61, %v101_v59 }
 0x187   :  { %149 = vpush %v103_v62 }
 0x188   :  { %151 = vpush %v113_v63 }
 0x1b8   :  { %s150_s11 = spop %149 }
 0x1b9   :  { %v115_v0 = vstv %s150_s11  ;;  %s152_s12 = spop %151 }
 0x1ba   :  { %116 = vst [vmem:[#allocation7] sm:$0xff] %v115_v0  ;;  %v117_v1 = vstv %s152_s12 }
 0x1bb   :  { %118 = vst [vmem:[#allocation8] sm:$0xff] %v117_v1 }
 0x1bc   :  { %226 = shalt.err (!%p223_p6)
}
 0x1bd   :  { %s227_s16 = scalar_lea.hbm %s348_s2, 128 }
 0x1be   :  { %p228_p7 = scmp.ne.s32.totalorder %s348_s2, %s227_s16  ;;  %p231_p8 = scmp.lt.u32.totalorder %s227_s16, %s348_s2 }
 0x1c0   :  { %p233_p9 = pnand %p231_p8, %p228_p7 }
 0x1c2   :  { %236 = shalt.err (!%p233_p9)
}
 0x1c3   :  { %128 = dma.vmem_to_hbm [thread:$0]  %s126_s8, 128, %s348_s2, [#allocation4]  }
 0x1c4   :  { %s237_s23 = scalar_lea.vmem %s315_s10, 128  ;;  %p242_p11 = scmp.lt.s32.totalorder %s315_s10, %s315_s10 }
 0x1c5   :  { %p238_p10 = scmp.ne.s32.totalorder %s315_s10, %s237_s23  ;;  %p243_p12 = scmp.lt.s32.totalorder %s237_s23, %s237_s23 }
 0x1c7   :  { %p244_p13 = por %p243_p12, %p242_p11 }
 0x1c9   :  { %p245_p0 = pnand %p244_p13, %p238_p10 }
 0x1cb   :  { %248 = shalt.err (!%p245_p0)
}
 0x1cc   :  { %s249_s26 = scalar_lea.hbm %s349_s3, 128 }
 0x1cd   :  { %p250_p1 = scmp.ne.s32.totalorder %s349_s3, %s249_s26  ;;  %p253_p2 = scmp.lt.u32.totalorder %s249_s26, %s349_s3 }
 0x1cf   :  { %p255_p3 = pnand %p253_p2, %p250_p1 }
 0x1d1   :  { %258 = shalt.err (!%p255_p3)
}
 0x1d2   :  { %138 = dma.vmem_to_hbm [thread:$0]  %s315_s10, 128, %s349_s3, [#allocation9]  }
 0x1d3   :  { %263 = dma.done.wait [#allocation4], 128  }
 0x1d4   :  { %264 = vsyncadd [#allocation4], 4294967168 }
 0x1d5   :  { %265 = dma.done.wait [#allocation9], 128  }
 0x1d6   :  { %266 = vsyncadd [#allocation9], 4294967168 }
 0x1d7   :  { %145 = vsyncpa [#allocation3], 1 }
 0x1d8   :  { %146 = vsyncpa [#allocation6], 1 }
 0x1d9   :  { %147 = vsyncpa [#allocation4], 1 }
 0x1da   :  { %148 = vsyncpa [#allocation9], 1 }

</bundles_post_ra>
